<compile_context>
chip_gen: v7x
topology: tpu7x:2x2x1
jax: 0.10.0
libtpu: 0.0.40
codegen_flags: <defaults>
</compile_context>

<pallas_src>
import functools

import jax
import jax.numpy as jnp
from jax.experimental import pallas as pl
from jax.experimental.pallas import tpu as pltpu


# ---------------------------------------------------------------------------
# helpers
# ---------------------------------------------------------------------------
def _pick_tile(dim, candidates):
    """Largest candidate that evenly divides `dim`, else the full dim.

    Callers guarantee `dim` is a multiple of 128 (sequence dims are padded,
    hidden dims asserted), so the full-dim fallback is never hit in practice.
    """
    for c in candidates:
        if c <= dim and dim % c == 0:
            return c
    return dim


# ---------------------------------------------------------------------------
# Tiled matmul kernels (K-reduction accumulator in VMEM scratch)
# ---------------------------------------------------------------------------
def _matmul_bias_kernel(x_ref, w_ref, b_ref, o_ref, acc_ref):
    k = pl.program_id(2)

    @pl.when(k == 0)
    def _():
        acc_ref[...] = jnp.zeros(acc_ref.shape, acc_ref.dtype)

    acc_ref[...] += jnp.dot(x_ref[...], w_ref[...],
                            preferred_element_type=jnp.float32)

    @pl.when(k == pl.num_programs(2) - 1)
    def _():
        # bias added exactly once, on the last K chunk
        o_ref[...] = (acc_ref[...] + b_ref[...].astype(jnp.float32)).astype(o_ref.dtype)


def _matmul_kernel(x_ref, w_ref, o_ref, acc_ref):
    k = pl.program_id(2)

    @pl.when(k == 0)
    def _():
        acc_ref[...] = jnp.zeros(acc_ref.shape, acc_ref.dtype)

    acc_ref[...] += jnp.dot(x_ref[...], w_ref[...],
                            preferred_element_type=jnp.float32)

    @pl.when(k == pl.num_programs(2) - 1)
    def _():
        o_ref[...] = acc_ref[...].astype(o_ref.dtype)


def _tiled_matmul(x, w, bias=None, out_dtype=None,
                  tm_c=(1024, 512, 256, 128),
                  tn_c=(1024, 512, 256, 128),
                  tk_c=(1024, 512, 256, 128)):
    """out = x @ w (+ bias).  x: [M, K], w: [K, N], bias: [1, N] or None."""
    M, K = x.shape
    K2, N = w.shape
    assert K == K2
    out_dtype = out_dtype if out_dtype is not None else x.dtype

    tm = _pick_tile(M, tm_c)
    tn = _pick_tile(N, tn_c)
    tk = _pick_tile(K, tk_c)
    grid = (M // tm, N // tn, K // tk)

    x_spec = pl.BlockSpec((tm, tk), lambda i, j, k: (i, k))
    w_spec = pl.BlockSpec((tk, tn), lambda i, j, k: (k, j))
    o_spec = pl.BlockSpec((tm, tn), lambda i, j, k: (i, j))
    cparams = pltpu.CompilerParams(
        dimension_semantics=("parallel", "parallel", "arbitrary"),
        vmem_limit_bytes=48 * 1024 * 1024)
    scratch = [pltpu.VMEM((tm, tn), jnp.float32)]

    if bias is not None:
        b_spec = pl.BlockSpec((1, tn), lambda i, j, k: (0, j))
        return pl.pallas_call(
            _matmul_bias_kernel,
            out_shape=jax.ShapeDtypeStruct((M, N), out_dtype),
            grid=grid,
            in_specs=[x_spec, w_spec, b_spec],
            out_specs=o_spec,
            scratch_shapes=scratch,
            compiler_params=cparams,
        )(x, w, bias)

    return pl.pallas_call(
        _matmul_kernel,
        out_shape=jax.ShapeDtypeStruct((M, N), out_dtype),
        grid=grid,
        in_specs=[x_spec, w_spec],
        out_specs=o_spec,
        scratch_shapes=scratch,
        compiler_params=cparams,
    )(x, w)


# ---------------------------------------------------------------------------
# Fused RoPE + causal flash attention over the packed [S, 3H] qkv buffer.
#
# grid = (heads, q_tiles, kv_tiles), kv innermost ("arbitrary").
#   * q tile is rotated (neox RoPE, softmax scale folded in) once per (h, qi)
#     into VMEM scratch; each k tile is rotated on load.
#   * KV blocks strictly above the diagonal are skipped for compute (pl.when)
#     AND for DMA (clamped index_map -> repeated block index -> no re-fetch).
#   * The causal mask is only materialized for blocks straddling the diagonal.
# Rotation identity (full-width tables, no concatenate in-kernel):
#   out = x * [cos, cos] + roll(x, D/2) * [-sin, sin]
# ---------------------------------------------------------------------------
def _flash_rope_attn_kernel(q_ref, k_ref, v_ref, cq_ref, sq_ref, ck_ref, sk_ref,
                            o_ref, qrot_scr, m_scr, l_scr, acc_scr, *, scale):
    tq = q_ref.shape[0]
    tkv = k_ref.shape[0]
    half = q_ref.shape[1] // 2
    qi = pl.program_id(1)
    ki = pl.program_id(2)
    q_start = qi * tq
    q_end = q_start + tq
    kv_start = ki * tkv

    @pl.when(kv_start < q_end)         # causal block skipping (compute)
    def _():
        @pl.when(ki == 0)
        def _():
            # rotate + scale the resident q tile once per (head, q-tile)
            qf = q_ref[...].astype(jnp.float32)
            q_rot = (qf * cq_ref[...] + pltpu.roll(qf, half, 1) * sq_ref[...]) * scale
            qrot_scr[...] = q_rot.astype(qrot_scr.dtype)
            m_scr[...] = jnp.full(m_scr.shape, -1e30, m_scr.dtype)
            l_scr[...] = jnp.zeros(l_scr.shape, l_scr.dtype)
            acc_scr[...] = jnp.zeros(acc_scr.shape, acc_scr.dtype)

        # rotate the k tile on load (VPU/XLU work hides under the MXU)
        kf = k_ref[...].astype(jnp.float32)
        k_rot = (kf * ck_ref[...] + pltpu.roll(kf, half, 1) * sk_ref[...]
                 ).astype(qrot_scr.dtype)

        # scores (q already carries the softmax scale)
        s = jax.lax.dot_general(qrot_scr[...], k_rot,
                                (((1,), (1,)), ((), ())),
                                preferred_element_type=jnp.float32)   # (tq, tkv)

        def update(scores):
            m_prev = m_scr[...]
            m_new = jnp.maximum(m_prev, jnp.max(scores, axis=-1, keepdims=True))
            alpha = jnp.exp(m_prev - m_new)
            p = jnp.exp(scores - m_new)
            l_scr[...] = alpha * l_scr[...] + jnp.sum(p, axis=-1, keepdims=True)
            acc_scr[...] = alpha * acc_scr[...] + jnp.dot(
                p.astype(v_ref.dtype), v_ref[...],
                preferred_element_type=jnp.float32)
            m_scr[...] = m_new

        # mask only where the block straddles the diagonal
        needs_mask = kv_start + tkv - 1 > q_start

        @pl.when(needs_mask)
        def _():
            row = q_start + jax.lax.broadcasted_iota(jnp.int32, (tq, tkv), 0)
            col = kv_start + jax.lax.broadcasted_iota(jnp.int32, (tq, tkv), 1)
            update(jnp.where(col <= row, s, jnp.float32(-1e30)))

        @pl.when(jnp.logical_not(needs_mask))
        def _():
            update(s)

        last_ki = (q_end - 1) // tkv
        @pl.when(ki == last_ki)
        def _():
            o_ref[...] = (acc_scr[...] *
                          pl.reciprocal(l_scr[...], approx=True)).astype(o_ref.dtype)


def _flash_attention(qkv, cos_full, sin_signed, num_heads, head_dim, scale,
                     out_dtype, tq, tkv):
    S = qkv.shape[0]
    H = num_heads * head_dim
    grid = (num_heads, S // tq, S // tkv)

    def kv_block(qi, ki):
        # clamp to the last causally-needed kv block -> no DMA for skipped blocks
        return jnp.minimum(ki, ((qi + 1) * tq - 1) // tkv)

    # column-offset index_maps into the packed [S, 3H] buffer (block units = head_dim)
    q_spec = pl.BlockSpec((tq, head_dim), lambda h, qi, ki: (qi, h))
    k_spec = pl.BlockSpec((tkv, head_dim),
                          lambda h, qi, ki: (kv_block(qi, ki), num_heads + h))
    v_spec = pl.BlockSpec((tkv, head_dim),
                          lambda h, qi, ki: (kv_block(qi, ki), 2 * num_heads + h))
    cq_spec = pl.BlockSpec((tq, head_dim), lambda h, qi, ki: (qi, 0))
    sq_spec = pl.BlockSpec((tq, head_dim), lambda h, qi, ki: (qi, 0))
    ck_spec = pl.BlockSpec((tkv, head_dim), lambda h, qi, ki: (kv_block(qi, ki), 0))
    sk_spec = pl.BlockSpec((tkv, head_dim), lambda h, qi, ki: (kv_block(qi, ki), 0))
    # lane-dense [S, H] output, head h written at column block h
    o_spec = pl.BlockSpec((tq, head_dim), lambda h, qi, ki: (qi, h))

    return pl.pallas_call(
        functools.partial(_flash_rope_attn_kernel, scale=scale),
        out_shape=jax.ShapeDtypeStruct((S, H), out_dtype),
        grid=grid,
        in_specs=[q_spec, k_spec, v_spec, cq_spec, sq_spec, ck_spec, sk_spec],
        out_specs=o_spec,
        scratch_shapes=[pltpu.VMEM((tq, head_dim), out_dtype),      # rotated q
                        pltpu.VMEM((tq, 1), jnp.float32),           # m
                        pltpu.VMEM((tq, 1), jnp.float32),           # l
                        pltpu.VMEM((tq, head_dim), jnp.float32)],   # acc
        compiler_params=pltpu.CompilerParams(
            dimension_semantics=("parallel", "parallel", "arbitrary"),
            vmem_limit_bytes=48 * 1024 * 1024),
    )(qkv, qkv, qkv, cos_full, sin_signed, cos_full, sin_signed)


# ---------------------------------------------------------------------------
# Full forward
# ---------------------------------------------------------------------------
def qwen_attention_forward(positions, hidden_states, params, num_heads,
                           rope_theta=10000.0, compute_dtype=jnp.bfloat16):
    S_in, Hdim = hidden_states.shape
    head_dim = Hdim // num_heads
    assert num_heads * head_dim == Hdim
    # Column-offset q/k/v blocks require a lane-aligned head_dim (real Qwen: 128).
    # TODO(synk): add a fallback path for head_dim % 128 != 0 (requires relayout).
    assert head_dim % 128 == 0, "head_dim must be a multiple of 128"
    scale = head_dim ** -0.5
    out_dtype = hidden_states.dtype

    # Pad the sequence to a multiple of 128 so tiles always divide cleanly
    # (padded q rows are sliced off; padded keys sit after all real rows, so
    # the causal mask keeps them invisible to real queries).
    pad = (-S_in) % 128
    if pad:
        hidden_states = jnp.pad(hidden_states, ((0, pad), (0, 0)))
        positions = jnp.pad(positions, (0, pad))
    S = S_in + pad

    # bf16 HBM-side operands for the MXU matmuls (f32 accumulation inside kernels)
    x = hidden_states.astype(compute_dtype)
    w_qkv = params["w_qkv"].astype(compute_dtype)
    w_proj = params["w_proj"].astype(compute_dtype)
    b_qkv = params["b_qkv"].astype(jnp.float32)

    # 1) fused QKV projection -> packed [S, 3H]
    qkv = _tiled_matmul(x, w_qkv, bias=b_qkv, out_dtype=compute_dtype)

    # 2) RoPE tables (neox), full lane width D, sign folded for the roll formulation
    inv_freq = 1.0 / (
        rope_theta ** (jnp.arange(0, head_dim, 2, dtype=jnp.float32) / head_dim))
    freqs = positions.astype(jnp.float32)[:, None] * inv_freq[None, :]   # [S, D/2]
    cos = jnp.cos(freqs)
    sin = jnp.sin(freqs)
    cos_full = jnp.concatenate([cos, cos], axis=-1)       # [S, D]
    sin_signed = jnp.concatenate([-sin, sin], axis=-1)    # [S, D]

    # 3) fused RoPE + causal flash attention reading q/k/v out of the packed buffer
    tq = _pick_tile(S, (1024, 512, 256, 128))
    tkv = _pick_tile(S, (512, 256, 128))
    attn = _flash_attention(qkv, cos_full, sin_signed, num_heads, head_dim,
                            scale, compute_dtype, tq, tkv)

    # 4) output projection (bias=False), back to the input dtype
    out = _tiled_matmul(attn, w_proj, bias=None, out_dtype=out_dtype)
    if pad:
        out = out[:S_in]
    return out


# ---------------------------------------------------------------------------
# Pure-JAX f32 reference (module semantics, for correctness check only)
# ---------------------------------------------------------------------------
def qwen_attention_reference(positions, hidden_states, params, num_heads,
                             rope_theta=10000.0):
    S, H = hidden_states.shape
    head_dim = H // num_heads
    scale = head_dim ** -0.5
    half = head_dim // 2

    qkv = hidden_states @ params["w_qkv"] + params["b_qkv"]
    q, k, v = jnp.split(qkv, 3, axis=-1)
    q = q.reshape(S, num_heads, head_dim).transpose(1, 0, 2)
    k = k.reshape(S, num_heads, head_dim).transpose(1, 0, 2)
    v = v.reshape(S, num_heads, head_dim).transpose(1, 0, 2)

    inv_freq = 1.0 / (
        rope_theta ** (jnp.arange(0, head_dim, 2, dtype=jnp.float32) / head_dim))
    freqs = positions.astype(jnp.float32)[:, None] * inv_freq[None, :]
    cos, sin = jnp.cos(freqs), jnp.sin(freqs)

    def rope(xh):
        x1, x2 = xh[..., :half], xh[..., half:]
        return jnp.concatenate([x1 * cos - x2 * sin, x2 * cos + x1 * sin], axis=-1)

    q, k = rope(q), rope(k)
    s = jnp.einsum("hqd,hkd->hqk", q, k) * scale
    mask = jnp.tril(jnp.ones((S, S), dtype=bool))
    s = jnp.where(mask[None], s, -jnp.inf)
    p = jax.nn.softmax(s, axis=-1)
    o = jnp.einsum("hqk,hkd->hqd", p, v).transpose(1, 0, 2).reshape(S, H)
    return o @ params["w_proj"]


# ---------------------------------------------------------------------------
if __name__ == "__main__":
    # Small config consistent with the module (head_dim = hidden // num_heads = 128,
    # as in real Qwen); seq_len is NOT a multiple of the tile size so the padding
    # path, causal block skipping and diagonal-only masking are all exercised.
    hidden_size = 256
    num_heads = 2
    seq_len = 600
    rope_theta = 10000.0

    key = jax.random.PRNGKey(0)
    k1, k2, k3, k4 = jax.random.split(key, 4)

    params = {
        "w_qkv": jax.random.normal(k1, (hidden_size, 3 * hidden_size), jnp.float32) * 0.05,
        "b_qkv": jax.random.normal(k2, (1, 3 * hidden_size), jnp.float32) * 0.05,
        "w_proj": jax.random.normal(k3, (hidden_size, hidden_size), jnp.float32) * 0.05,
    }
    hidden_states = jax.random.normal(k4, (seq_len, hidden_size), jnp.float32)
    positions = jnp.arange(seq_len, dtype=jnp.int32)

    out = qwen_attention_forward(positions, hidden_states, params, num_heads,
                                 rope_theta)
    out = jax.block_until_ready(out)

    ref = qwen_attention_reference(positions, hidden_states, params, num_heads,
                                   rope_theta)
    assert out.shape == (seq_len, hidden_size)
    rel_err = float(jnp.linalg.norm(out.astype(jnp.float32) - ref) /
                    jnp.linalg.norm(ref))
    assert rel_err < 2e-2, f"mismatch vs reference: rel_err={rel_err}"

    print("KERNEL_OK")
</pallas_src>

<mosaic_0001>
module attributes {stable_mosaic.version = 11 : i64} {
  func.func @_matmul_bias_kernel(%arg0: i32, %arg1: i32, %arg2: i32, %arg3: memref<128x256xbf16, #tpu.memory_space<vmem>>, %arg4: memref<256x256xbf16, #tpu.memory_space<vmem>>, %arg5: memref<1x256xf32, #tpu.memory_space<vmem>>, %arg6: memref<128x256xbf16, #tpu.memory_space<vmem>>, %arg7: memref<128x256xf32, #tpu.memory_space<vmem>>) attributes {dimension_semantics = [#tpu.dimension_semantics<parallel>, #tpu.dimension_semantics<parallel>, #tpu.dimension_semantics<arbitrary>], iteration_bounds = array<i64: 5, 3, 1>, scalar_prefetch = 0 : i64, scratch_operands = 1 : i64, tpu.core_type = #tpu.core_type<tc>, window_params = [{transform_indices = @transform_0, window_bounds = array<i64: 128, 256>}, {transform_indices = @transform_1, window_bounds = array<i64: 256, 256>}, {transform_indices = @transform_2, window_bounds = array<i64: 1, 256>}, {transform_indices = @transform_3, window_bounds = array<i64: 128, 256>}]} {
    %c0_i32 = arith.constant 0 : i32
    %0 = arith.cmpi eq, %arg2, %c0_i32 : i32
    %1 = arith.extui %0 : i1 to i32
    %c0_i32_0 = arith.constant 0 : i32
    %2 = arith.cmpi ne, %1, %c0_i32_0 : i32
    scf.if %2 {
      %cst_10 = arith.constant 0.000000e+00 : f32
      %12 = vector.broadcast %cst_10 : f32 to vector<128x256xf32>
      %c0_11 = arith.constant 0 : index
      %c0_12 = arith.constant 0 : index
      %13 = vector.load %arg7[%c0_11, %c0_12] : memref<128x256xf32, #tpu.memory_space<vmem>>, vector<128x256xf32>
      tpu.vector_store %arg7[%c0_11, %c0_12], %12 {strides = array<i32>} : memref<128x256xf32, #tpu.memory_space<vmem>>, vector<128x256xf32>,
    } else {
    }
    %c0 = arith.constant 0 : index
    %c0_1 = arith.constant 0 : index
    %3 = vector.load %arg7[%c0, %c0_1] : memref<128x256xf32, #tpu.memory_space<vmem>>, vector<128x256xf32>
    %c0_2 = arith.constant 0 : index
    %c0_3 = arith.constant 0 : index
    %4 = vector.load %arg3[%c0_2, %c0_3] : memref<128x256xbf16, #tpu.memory_space<vmem>>, vector<128x256xbf16>
    %c0_4 = arith.constant 0 : index
    %c0_5 = arith.constant 0 : index
    %5 = vector.load %arg4[%c0_4, %c0_5] : memref<256x256xbf16, #tpu.memory_space<vmem>>, vector<256x256xbf16>
    %cst = arith.constant dense<0.000000e+00> : vector<128x256xf32>
    %6 = tpu.matmul %4, %5, %cst {dimension_numbers = #tpu.dot_dimension_numbers<[1], [0], [0], [1], [0, 0, 1, 1], [], []>} : vector<128x256xbf16>, vector<256x256xbf16>, vector<128x256xf32> -> vector<128x256xf32>
    %7 = arith.addf %3, %6 : vector<128x256xf32>
    %c0_6 = arith.constant 0 : index
    %c0_7 = arith.constant 0 : index
    %8 = vector.load %arg7[%c0_6, %c0_7] : memref<128x256xf32, #tpu.memory_space<vmem>>, vector<128x256xf32>
    tpu.vector_store %arg7[%c0_6, %c0_7], %7 {strides = array<i32>} : memref<128x256xf32, #tpu.memory_space<vmem>>, vector<128x256xf32>,
    %c0_i32_8 = arith.constant 0 : i32
    %9 = arith.cmpi eq, %arg2, %c0_i32_8 : i32
    %10 = arith.extui %9 : i1 to i32
    %c0_i32_9 = arith.constant 0 : i32
    %11 = arith.cmpi ne, %10, %c0_i32_9 : i32
    scf.if %11 {
      %c0_10 = arith.constant 0 : index
      %c0_11 = arith.constant 0 : index
      %12 = vector.load %arg7[%c0_10, %c0_11] : memref<128x256xf32, #tpu.memory_space<vmem>>, vector<128x256xf32>
      %c0_12 = arith.constant 0 : index
      %c0_13 = arith.constant 0 : index
      %13 = vector.load %arg5[%c0_12, %c0_13] : memref<1x256xf32, #tpu.memory_space<vmem>>, vector<1x256xf32>
      %14 = vector.broadcast %13 : vector<1x256xf32> to vector<128x256xf32>
      %15 = arith.addf %12, %14 : vector<128x256xf32>
      %16 = arith.truncf %15 : vector<128x256xf32> to vector<128x256xbf16>
      %c0_14 = arith.constant 0 : index
      %c0_15 = arith.constant 0 : index
      %17 = vector.load %arg6[%c0_14, %c0_15] : memref<128x256xbf16, #tpu.memory_space<vmem>>, vector<128x256xbf16>
      tpu.vector_store %arg6[%c0_14, %c0_15], %16 {strides = array<i32>} : memref<128x256xbf16, #tpu.memory_space<vmem>>, vector<128x256xbf16>,
    } else {
    }
    return
  }
  func.func @transform_0(%arg0: i32, %arg1: i32, %arg2: i32) -> (i32, i32) {
    %c0_i32 = arith.constant 0 : i32
    return %arg0, %arg2 : i32, i32
  }
  func.func @transform_1(%arg0: i32, %arg1: i32, %arg2: i32) -> (i32, i32) {
    %c0_i32 = arith.constant 0 : i32
    return %arg2, %arg1 : i32, i32
  }
  func.func @transform_2(%arg0: i32, %arg1: i32, %arg2: i32) -> (i32, i32) {
    %c0_i32 = arith.constant 0 : i32
    %c0_i32_0 = arith.constant 0 : i32
    return %c0_i32, %arg1 : i32, i32
  }
  func.func @transform_3(%arg0: i32, %arg1: i32, %arg2: i32) -> (i32, i32) {
    %c0_i32 = arith.constant 0 : i32
    return %arg0, %arg1 : i32, i32
  }
}

</mosaic_0001>

<bundles_post_ra>
// kernel: tpu_custom_call.1
= control target key start
LH: loop header
LB: loop body
LE: loop exit
PB: predicated region body
PF: predicated region fallthrough
CT: control target
= control target key end

     0   :  { %s2207_s0 = inlined_call_operand.hbm [shape: bf16[640,256], index: 0, kind: input, shape index: {}]   ;;  %s2208_s1 = inlined_call_operand.hbm [shape: bf16[256,768], index: 1, kind: input, shape index: {}]   ;;  %s2209_s2 = inlined_call_operand.vmem [shape: f32[1,768], index: 2, kind: input, shape index: {}]   ;;  %s2210_s3 = inlined_call_operand.hbm [shape: bf16[640,768], index: 3, kind: output, shape index: {}]  }
   0x1   :  { %2224 = sst [smem:[#allocation18_spill]] %s2207_s0 }
   0x2   :  { %2225 = sst [smem:[#allocation19_spill]] %s2209_s2 }
   0x3   :  { %2226 = sst [smem:[#allocation20_spill]] %s2210_s3 }
   0x4   :  { %8 = vsyncpa [#allocation4], 0 }
   0x5   :  { %10 = vsyncpa [#allocation4 + $0x1], 0 }
   0x6   :  { %11 = vsyncpa [#allocation7], 0 }
   0x7   :  { %13 = vsyncpa [#allocation7 + $0x1], 0 }
   0x8   :  { %14 = vsyncpa [#allocation5], 0 }
   0x9   :  { %16 = vsyncpa [#allocation5 + $0x1], 0  ;;  %s1743_s12 = smov 0   ;;  %s1745_s13 = smov 0  }
   0xa   :  { %s1747_s14 = smov 0   ;;  %s1749_s15 = smov 0  }
   0xb   :  { %s1751_s16 = smov 0   ;;  %s1753_s17 = smov 0  }
   0xc   :  { %s1755_s18 = smov 0   ;;  %s1757_s19 = smov 0  }
   0xd   :  { %s1759_s20 = smov 0   ;;  %s1761_s21 = smov 0  }
   0xe   :  { %s1763_s22 = smov 0   ;;  %s1765_s23 = smov 0  }
   0xf   :  { %s1767_s24 = smov 0   ;;  %s1769_s25 = smov 0  }
  0x10 LB: > { %2227 = sst [smem:[#allocation12_spill]] %s1700_s22  ;;  %s1154_s26 = sadd.s32 4294967295, %s1712_s25   ;;  %s1712_s25 = sphi %s1769_s25, %s22_s25   ;;  %s1708_s24 = sphi %s1767_s24, %s2263_s24   ;;  %s1704_s23 = sphi %s1765_s23, %s2274_s23   ;;  %s1700_s22 = sphi %s1763_s22, %s2261_s22   ;;  %s1696_s21 = sphi %s1761_s21, %s2273_s21   ;;  %s1692_s20 = sphi %s1759_s20, %s2272_s20   ;;  %s1688_s19 = sphi %s1757_s19, %s2271_s19   ;;  %s1684_s18 = sphi %s1755_s18, %s2270_s18   ;;  %s1680_s17 = sphi %s1753_s17, %s2269_s17   ;;  %s1676_s16 = sphi %s1751_s16, %s2268_s16   ;;  %s1672_s15 = sphi %s1749_s15, %s2267_s15   ;;  %s1668_s14 = sphi %s1747_s14, %s2266_s14   ;;  %s1664_s13 = sphi %s1745_s13, %s2265_s13   ;;  %s1660_s12 = sphi %s1743_s12, %s2264_s12  }
  0x11   : > { %2228 = sst [smem:[#allocation13_spill]] %s1708_s24  ;;  %p57_p0 = scmp.ne.s32.totalorder %s1692_s20, %s1688_s19 }
  0x12   : > { %p2212_p1 = scmp.eq.s32.totalorder %s1712_s25, 0  ;;  %p63_p2 = scmp.ne.s32.totalorder %s1688_s19, %s1684_s18 }
  0x13   : > { %p1818_p3 = scmp.eq.s32.totalorder %s1154_s26, 0  ;;  %p1822_p4 = scmp.eq.s32.totalorder %s1154_s26, 14 }
  0x14   : > { %p59_p5 = por %p2212_p1, %p57_p0  ;;  %p2211_p7 = scmp.lt.s32.totalorder %s1712_s25, 15 }
  0x15   : > { %s2230_s30 = scalar_select %p1822_p4, 1, 0 }
  0x16   : > { %p1830_p6 = por %p1818_p3, %p63_p2  ;;  %s169_s5 = sand.u32 1, %s1692_s20  }
  0x17   : > { %s1242_s6 = sshll.u32 %s1708_s24, 11  ;;  %s1158_s7 = sshll.u32 %s169_s5, 7 }
  0x18   : > { %s2231_s4 = scalar_select %p1830_p6, 1, 0 }
  0x19   : > { %s2232_s0 = sld [smem:[#allocation18_spill]]  ;;  %s173_s11 = scalar_lea.vmem [#allocation3], %s1158_s7 }
  0x1a   : > { %s183_s18 = sshll.u32 %s173_s11, 4  ;;  %p1844_p8 = pnand %p2211_p7, %p59_p5  ;;  %s1848_s18 = int_to_ptr.vmem [resolvable:$true] %s183_s18 }
  0x1b   : > { %s1850_s28 = scalar_lea.sflag [#allocation4], %s169_s5 }
  0x1c   : > { %p1504_p10 = pneg %p1844_p8 }
  0x1f   : > { %s1840_s10 = scalar_lea.hbm %s2232_s0, %s1242_s6  ;;  %s1507_s9 = scalar_lea.hbm %s2232_s0, 10240 }
  0x20   : > { %s1502_s8 = scalar_lea.hbm %s1840_s10, 2048  ;;  %p1508_p13 = scmp.lt.u32.totalorder %s1840_s10, %s2232_s0 }
  0x21   : > { %p1503_p9 = scmp.ne.s32.totalorder %s1840_s10, %s1502_s8  ;;  %p1509_p0 = scmp.lt.u32.totalorder %s1507_s9, %s1502_s8 }
  0x22   : > { %p1511_p5 = scmp.lt.u32.totalorder %s1502_s8, %s1840_s10 }
  0x23   : > { %p1505_p11 = pnand %p1504_p10, %p1503_p9  ;;  %p1510_p2 = por %p1509_p0, %p1508_p13 }
  0x25   : > { %p1506_p12 = pneg %p1505_p11  ;;  %p1512_p7 = por %p1511_p5, %p1510_p2 }
  0x27   : > { %p1513_p1 = pnand %p1512_p7, %p1506_p12 }
  0x29   : > { %1516 = shalt.err (!%p1513_p1)
}
  0x2a   : > { %s1517_s5 = scalar_lea.vmem %s1848_s18, 2048  ;;  %s1714_s6 = smov [#allocation3]  }
  0x2b   : > { %p1518_p9 = scmp.ne.s32.totalorder %s1848_s18, %s1517_s5  ;;  %s1522_s7 = sshll.u32 %s1714_s6, 4  ;;  %s1523_s7 = int_to_ptr.vmem [resolvable:$false] %s1522_s7 }
  0x2c   : > { %s1524_s27 = scalar_lea.vmem %s1523_s7, 4096  ;;  %p1525_p4 = scmp.lt.s32.totalorder %s1848_s18, %s1523_s7 }
  0x2d   : > { %p1520_p11 = pnand %p1518_p9, %p1504_p10  ;;  %p1526_p13 = scmp.lt.s32.totalorder %s1524_s27, %s1517_s5 }
  0x2f   : > { %p1521_p6 = pneg %p1520_p11  ;;  %p1527_p0 = por %p1526_p13, %p1525_p4 }
  0x31   : > { %p1528_p2 = pnand %p1527_p0, %p1521_p6 }
  0x33   : > { %1531 = shalt.err (!%p1528_p2)
}
  0x34   : > { %s2214_s8 = smov 128   ;;  %s2215_s9 = smov 8  }
  0x35   : > { %1302 = dma.hbm_to_vmem [thread:$0]  (!%p1844_p8), %s1840_s10, 2048, %s1848_s18, %s1850_s28, %s2214_s8, %s2214_s8, %s2215_s9  }
  0x36   : > { %p1165_p1 = scmp.ge.s32.totalorder %s1712_s25, 1  ;;  %p223_p4 = scmp.lt.s32.totalorder %s1712_s25, 16 }
  0x37   : > { %s1155_s5 = sadd.s32 4294967294, %s1712_s25   ;;  %s37_s6 = sadd.s32 1, %s1704_s23 }
  0x38   : > { %p1883_p6 = pnand %p1165_p1, %p223_p4  ;;  %s78_s7 = sadd.s32 1, %s1680_s17 }
  0x39   : > { %p39_p7 = scmp.ge.s32.totalorder %s37_s6, 3  ;;  %p85_p10 = scmp.ne.s32.totalorder %s1680_s17, %s1676_s16 }
  0x3a   : > { %p91_p12 = scmp.ne.s32.totalorder %s1676_s16, %s1672_s15  ;;  %s132_s26 = sadd.s32 1, %s1668_s14 }
  0x3b   : > { %s2276_s6 = smov (%p39_p7, %s37_s6), 0  ;;  %s2236_s28 = sadd.s32 1, %s1708_s24 }
  0x3c   : > { %2235 = sst [smem:[#allocation14_spill]] %s2276_s6  ;;  %s2278_s28 = smov (!%p39_p7, %s2236_s28), %s1708_s24 }
  0x3d   : > { %s74_s10 = ssub.s32 %s1704_s23, %s2276_s6  ;;  %p2237_p8 = scmp.eq.s32.totalorder %s1712_s25, 0 }
  0x3e   : > { %p43_p9 = scmp.ge.s32.totalorder %s2278_s28, 5  ;;  %p76_p11 = scmp.eq.s32.totalorder %s74_s10, 0 }
  0x3f   : > { %p1904_p5 = por %p85_p10, %p2237_p8  ;;  %p1910_p13 = por %p91_p12, %p1818_p3 }
  0x40   : > { %p142_p0 = scmp.ne.s32.totalorder %s1668_s14, %s1664_s13  ;;  %s2280_s28 = smov (%p43_p9, %s2278_s28), 0 }
  0x41   : > { %s2239_s15 = scalar_select %p1910_p13, 1, 0 }
  0x42   : > { %2240 = sst [smem:[#allocation15_spill]] %s2280_s28  ;;  %s45_s8 = ssub.s32 %s1708_s24, %s2280_s28 }
  0x43   : > { %s1919_s27 = scalar_select %p76_p11, %s1680_s17, %s78_s7  }
  0x44   : > { %p2242_p2 = scmp.ne.s32.totalorder %s2230_s30, 0  ;;  %p48_p4 = scmp.eq.s32.totalorder %s45_s8, 0 }
  0x45   : > { %2241 = sst [smem:[#allocation16_spill]] %s1919_s27  ;;  %s129_s29 = sor.u32 %s74_s10, %s45_s8 }
  0x46   : > { %p1925_p1 = por %p2242_p2, %p142_p0  ;;  %p130_p3 = scmp.eq.s32.totalorder %s129_s29, 0 }
  0x47   : > { %p148_p7 = scmp.ne.s32.totalorder %s1664_s13, %s1660_s12  ;;  %s2245_s0 = sadd.s32 1, %s1692_s20 }
  0x48   : > { %s2243_s9 = scalar_select %p1925_p1, 1, 0 }
  0x49   : > { %s1934_s6 = scalar_select %p48_p4, %s1692_s20, %s2245_s0  }
  0x4a   : > { %2244 = sst [smem:[#allocation17_spill]] %s2243_s9  ;;  %p149_p10 = scmp.eq.s32.totalorder %s1155_s5, 14 }
  0x4b   : > { %s1937_s3 = scalar_select %p130_p3, %s1668_s14, %s132_s26  }
  0x4c   : > { %s193_s7 = sand.u32 1, %s1680_s17   ;;  %p1940_p12 = por %p149_p10, %p148_p7 }
  0x4d   : > { %s1162_s27 = sshll.u32 %s193_s7, 8  ;;  %s1243_s28 = sshll.u32 %s1704_s23, 7 }
  0x4e   : > { %s2246_s30 = scalar_select %p1940_p12, 1, 0 }
  0x4f   : > { %s197_s24 = scalar_lea.vmem [#allocation6], %s1162_s27  ;;  %s1948_s8 = scalar_lea.hbm %s2208_s1, %s1243_s28 }
  0x50   : > { %s207_s9 = sshll.u32 %s197_s24, 4  ;;  %p2247_p8 = scmp.lt.s32.totalorder %s1712_s25, 15  ;;  %s1950_s9 = int_to_ptr.vmem [resolvable:$true] %s207_s9 }
  0x51   : > { %s1960_s24 = scalar_lea.sflag [#allocation7], %s193_s7  ;;  %s1532_s5 = scalar_lea.hbm %s1948_s8, 4096 }
  0x52   : > { %p1956_p9 = pnand %p2247_p8, %p1904_p5  ;;  %p1533_p11 = scmp.ne.s32.totalorder %s1948_s8, %s1532_s5 }
  0x53   : > { %s1537_s26 = scalar_lea.hbm %s2208_s1, 12288  ;;  %p1538_p5 = scmp.lt.u32.totalorder %s1948_s8, %s2208_s1 }
  0x54   : > { %p1534_p0 = pneg %p1956_p9  ;;  %p1539_p3 = scmp.lt.u32.totalorder %s1537_s26, %s1532_s5 }
  0x55   : > { %p1541_p10 = scmp.lt.u32.totalorder %s1532_s5, %s1948_s8 }
  0x56   : > { %p1535_p2 = pnand %p1534_p0, %p1533_p11  ;;  %p1540_p7 = por %p1539_p3, %p1538_p5 }
  0x58   : > { %p1536_p4 = pneg %p1535_p2  ;;  %p1542_p8 = por %p1541_p10, %p1540_p7 }
  0x5a   : > { %p1543_p12 = pnand %p1542_p8, %p1536_p4 }
  0x5c   : > { %1546 = shalt.err (!%p1543_p12)
}
  0x5d   : > { %s1547_s18 = scalar_lea.vmem %s1950_s9, 4096  ;;  %s1717_s27 = smov [#allocation6]  }
  0x5e   : > { %p1548_p11 = scmp.ne.s32.totalorder %s1950_s9, %s1547_s18  ;;  %s1552_s29 = sshll.u32 %s1717_s27, 4  ;;  %s1553_s29 = int_to_ptr.vmem [resolvable:$false] %s1552_s29 }
  0x5f   : > { %s1554_s7 = scalar_lea.vmem %s1553_s29, 8192  ;;  %p1555_p13 = scmp.lt.s32.totalorder %s1950_s9, %s1553_s29 }
  0x60   : > { %p1550_p2 = pnand %p1548_p11, %p1534_p0  ;;  %p1556_p5 = scmp.lt.s32.totalorder %s1554_s7, %s1547_s18 }
  0x62   : > { %p1551_p1 = pneg %p1550_p2  ;;  %p1557_p3 = por %p1556_p5, %p1555_p13 }
  0x64   : > { %p1558_p7 = pnand %p1557_p3, %p1551_p1 }
  0x66   : > { %1561 = shalt.err (!%p1558_p7)
}
  0x67   : > { %s1718_s5 = smov 384   ;;  %s2249_s2 = smov 8  }
  0x68   : > { %s2250_s22 = smov 128   ;;  %227 = sbr.rel (%p1883_p6) target bundleno = 440 (0x1b8), region = 32 }
  0x69   : > { %1305 = dma.hbm_to_vmem [thread:$0]  (!%p1956_p9), %s1948_s8, 4096, %s1950_s9, %s1960_s24, %s1718_s5, %s2250_s22, %s2249_s2  }
  0x6a   : > { %s229_s26 = sand.u32 (!%p1883_p6), 1, %s1688_s19   ;;  %p2251_p13 = scmp.ne.s32.totalorder (!%p1883_p6), %s2231_s4, 0 }
  0x6b   : > { %s1166_s28 = sshll.u32 (!%p1883_p6), %s229_s26, 7  ;;  %s230_s10 = scalar_lea.sflag (!%p1883_p6), [#allocation4], %s229_s26 }
  0x6c   : > { %s1993_s18 = scalar_lea.vmem (!%p1883_p6), [#allocation3], %s1166_s28 }
  0x6f   : > { %1647 = dma.done.wait (%p2251_p13), %s230_s10, 2048  }
  0x70   : > { %1649 = vsyncadd (%p2251_p13), %s230_s10, 4294965248  ;;  %s238_s0 = sand.u32 1, %s1676_s16   ;;  %p2252_p6 = scmp.ne.s32.totalorder %s2239_s15, 0 }
  0x71   : > { %s1167_s27 = sshll.u32 %s238_s0, 8  ;;  %s239_s9 = scalar_lea.sflag [#allocation7], %s238_s0 }
  0x72   : > { %s2000_s8 = scalar_lea.vmem [#allocation6], %s1167_s27 }
  0x73   : > { %1651 = dma.done.wait (%p2252_p6), %s239_s9, 4096  }
  0x74   : > { %1653 = vsyncadd (%p2252_p6), %s239_s9, 4294963200  ;;  %v1430_v0 = vld [vmem:[%s2000_s8 + $0x4] ss:$8 sps:$4 sm:$0xff]   ;;  %v1432_v1 = vld [vmem:[%s2000_s8] ss:$8 sps:$4 sm:$0xff]   ;;  %s2055_s4 = sshll.u32 %s1696_s21, 1  ;;  %v855_v48 = vlaneseq }
  0x75   : > { %641 = vmatprep.subr.bf16.mxu0 %v1430_v0  ;;  %1260 = vmatprep.subr.bf16.mxu1 %v1430_v0  ;;  %v1433_v2 = vld [vmem:[%s2000_s8 + $0x14] ss:$8 sps:$4 sm:$0xff]   ;;  %v1435_v3 = vld [vmem:[%s2000_s8 + $0x10] ss:$8 sps:$4 sm:$0xff]   ;;  %v1436_v4 = vld [vmem:[%s2000_s8 + $0x24] ss:$8 sps:$4 sm:$0xff]  }
  0x76   : > { %642 = vmatpush1.bf16.msra.mxu0 %v1432_v1  ;;  %1276 = vmatpush1.bf16.msra.mxu1 %v1432_v1  ;;  %v1438_v5 = vld [vmem:[%s2000_s8 + $0x20] ss:$8 sps:$4 sm:$0xff]   ;;  %v1439_v6 = vld [vmem:[%s2000_s8 + $0x34] ss:$8 sps:$4 sm:$0xff]   ;;  %v1441_v7 = vld [vmem:[%s2000_s8 + $0x30] ss:$8 sps:$4 sm:$0xff]  }
  0x77   : > { %643 = vmatprep.subr.bf16.mxu0 %v1433_v2  ;;  %1261 = vmatprep.subr.bf16.mxu1 %v1433_v2  ;;  %v1442_v8 = vld [vmem:[%s2000_s8 + $0x44] ss:$8 sps:$4 sm:$0xff]   ;;  %v1444_v9 = vld [vmem:[%s2000_s8 + $0x40] ss:$8 sps:$4 sm:$0xff]   ;;  %v1445_v10 = vld [vmem:[%s2000_s8 + $0x54] ss:$8 sps:$4 sm:$0xff]  }
  0x78   : > { %v1447_v11 = vld [vmem:[%s2000_s8 + $0x50] ss:$8 sps:$4 sm:$0xff]   ;;  %v1448_v12 = vld [vmem:[%s2000_s8 + $0x64] ss:$8 sps:$4 sm:$0xff]   ;;  %v1450_v14 = vld [vmem:[%s2000_s8 + $0x60] ss:$8 sps:$4 sm:$0xff]  }
  0x79   : > { %v1480_v13 = vld [vmem:[%s1993_s18 + $0x4] ss:$8 sps:$4 sm:$0xff]   ;;  %v1451_v16 = vld [vmem:[%s2000_s8 + $0x74] ss:$8 sps:$4 sm:$0xff]   ;;  %v1453_v17 = vld [vmem:[%s2000_s8 + $0x70] ss:$8 sps:$4 sm:$0xff]  }
  0x7a   : > { %644 = vmatpush1.bf16.msra.mxu0 %v1435_v3  ;;  %1277 = vmatpush1.bf16.msra.mxu1 %v1435_v3  ;;  %v1483_v15 = vld [vmem:[%s1993_s18 + $0x44] ss:$8 sps:$4 sm:$0xff]   ;;  %v1456_v19 = vld [vmem:[%s2000_s8 + $0x80] ss:$8 sps:$4 sm:$0xff]   ;;  %v1457_v20 = vld [vmem:[%s2000_s8 + $0x94] ss:$8 sps:$4 sm:$0xff]  }
  0x7b   : > { %645 = vmatprep.subr.bf16.mxu0 %v1436_v4  ;;  %1262 = vmatprep.subr.bf16.mxu1 %v1436_v4  ;;  %v1454_v18 = vld [vmem:[%s2000_s8 + $0x84] ss:$8 sps:$4 sm:$0xff]   ;;  %v1459_v21 = vld [vmem:[%s2000_s8 + $0x90] ss:$8 sps:$4 sm:$0xff]   ;;  %v1462_v23 = vld [vmem:[%s2000_s8 + $0xa0] ss:$8 sps:$4 sm:$0xff]  }
  0x7c   : > { %673 = vmatprep.mubr.bf16.mxu0 %v1480_v13  ;;  %713 = vmatprep.mubr.bf16.mxu1 %v1483_v15  ;;  %v1460_v22 = vld [vmem:[%s2000_s8 + $0xa4] ss:$8 sps:$4 sm:$0xff]   ;;  %v1463_v24 = vld [vmem:[%s2000_s8 + $0xb4] ss:$8 sps:$4 sm:$0xff]   ;;  %v1465_v25 = vld [vmem:[%s2000_s8 + $0xb0] ss:$8 sps:$4 sm:$0xff]  }
  0x7d   : > { %v1466_v26 = vld [vmem:[%s2000_s8 + $0xc4] ss:$8 sps:$4 sm:$0xff]   ;;  %v1468_v27 = vld [vmem:[%s2000_s8 + $0xc0] ss:$8 sps:$4 sm:$0xff]   ;;  %v1469_v28 = vld [vmem:[%s2000_s8 + $0xd4] ss:$8 sps:$4 sm:$0xff]  }
  0x7e   : > { %646 = vmatpush1.bf16.msra.mxu0 %v1438_v5  ;;  %1278 = vmatpush1.bf16.msra.mxu1 %v1438_v5  ;;  %v1471_v29 = vld [vmem:[%s2000_s8 + $0xd0] ss:$8 sps:$4 sm:$0xff]   ;;  %v1472_v30 = vld [vmem:[%s2000_s8 + $0xe4] ss:$8 sps:$4 sm:$0xff]   ;;  %v1474_v31 = vld [vmem:[%s2000_s8 + $0xe0] ss:$8 sps:$4 sm:$0xff]  }
  0x7f   : > { %647 = vmatprep.subr.bf16.mxu0 %v1439_v6  ;;  %1263 = vmatprep.subr.bf16.mxu1 %v1439_v6  ;;  %v1475_v32 = vld [vmem:[%s2000_s8 + $0xf4] ss:$8 sps:$4 sm:$0xff]   ;;  %v1477_v33 = vld [vmem:[%s2000_s8 + $0xf0] ss:$8 sps:$4 sm:$0xff]   ;;  %v1478_v34 = vld [vmem:[%s1993_s18] ss:$8 sps:$4 sm:$0xff]  }
  0x80   : > { %v1481_v35 = vld [vmem:[%s1993_s18 + $0x40] ss:$8 sps:$4 sm:$0xff]   ;;  %v1484_v36 = vld [vmem:[%s1993_s18 + $0x14] ss:$8 sps:$4 sm:$0xff]   ;;  %v1488_v38 = vld [vmem:[%s1993_s18 + $0x10] ss:$8 sps:$4 sm:$0xff]  }
  0x81   : > { %v1486_v37 = vld [vmem:[%s1993_s18 + $0x54] ss:$8 sps:$4 sm:$0xff]   ;;  %v1489_v39 = vld [vmem:[%s1993_s18 + $0x50] ss:$8 sps:$4 sm:$0xff]   ;;  %v1490_v40 = vld [vmem:[%s1993_s18 + $0x24] ss:$8 sps:$4 sm:$0xff]  }
  0x82   : > { %648 = vmatpush1.bf16.msra.mxu0 %v1441_v7  ;;  %1279 = vmatpush1.bf16.msra.mxu1 %v1441_v7  ;;  %v1492_v41 = vld [vmem:[%s1993_s18 + $0x64] ss:$8 sps:$4 sm:$0xff]   ;;  %v1494_v42 = vld [vmem:[%s1993_s18 + $0x20] ss:$8 sps:$4 sm:$0xff]   ;;  %v1496_v44 = vld [vmem:[%s1993_s18 + $0x34] ss:$8 sps:$4 sm:$0xff]  }
  0x83   : > { %649 = vmatprep.subr.bf16.mxu0 %v1442_v8  ;;  %1264 = vmatprep.subr.bf16.mxu1 %v1442_v8  ;;  %v1495_v43 = vld [vmem:[%s1993_s18 + $0x60] ss:$8 sps:$4 sm:$0xff]   ;;  %v1498_v45 = vld [vmem:[%s1993_s18 + $0x74] ss:$8 sps:$4 sm:$0xff]   ;;  %v1500_v46 = vld [vmem:[%s1993_s18 + $0x30] ss:$8 sps:$4 sm:$0xff]  }
  0x84   : > { %v1501_v47 = vld [vmem:[%s1993_s18 + $0x70] ss:$8 sps:$4 sm:$0xff]   ;;  %p279_p1 = scmp.lt.s32.totalorder %s2055_s4, 5  ;;  %v856_v49 = vshrl.u32 %v855_v48, 7  ;;  %s2253_s29 = sld [smem:[#allocation19_spill]] }
  0x85   : > { %s271_s5 = sand.u32 1, %s1664_s13   ;;  %s2254_s22 = sld [smem:[#allocation12_spill]] }
  0x86   : > { %650 = vmatpush1.bf16.msra.mxu0 %v1444_v9  ;;  %1280 = vmatpush1.bf16.msra.mxu1 %v1444_v9  ;;  %s280_s11 = scalar_select %p279_p1, %s2055_s4, 5  ;;  %v857_v50 = vsub.s32 0, %v856_v49  ;;  %v861_v52 = vsub.s32 1, %v856_v49 }
  0x87   : > { %651 = vmatprep.subr.bf16.mxu0 %v1445_v10  ;;  %1265 = vmatprep.subr.bf16.mxu1 %v1445_v10  ;;  %s1168_s21 = sshll.u32 %s271_s5, 7  ;;  %s2255_s0 = sld [smem:[#allocation17_spill]] }
  0x88   : > { %s2077_s2 = scalar_lea.vmem [#allocation8], %s1168_s21  ;;  %s2256_s8 = sld [smem:[#allocation20_spill]] }
  0x89   : > { %s1026_s18 = sshll.u32 %s2077_s2, 4  ;;  %s1719_s24 = smov [#allocation8]   ;;  %s2123_s18 = int_to_ptr.vmem [resolvable:$true] %s1026_s18 }
  0x8a   : > { %652 = vmatpush1.bf16.msra.mxu0 %v1447_v11  ;;  %1281 = vmatpush1.bf16.msra.mxu1 %v1447_v11  ;;  %s281_s7 = scalar_lea.vmem %s2253_s29, %s280_s11  ;;  %s2131_s11 = scalar_lea.sflag [#allocation5], %s271_s5 }
  0x8b   : > { %653 = vmatprep.subr.bf16.mxu0 %v1448_v12  ;;  %1266 = vmatprep.subr.bf16.mxu1 %v1448_v12  ;;  %v853_v51 = vld [vmem:[%s281_s7] sm:$0x3]  ;;  %s1292_s26 = smul.u32 96, %s2254_s22  ;;  %s1562_s15 = scalar_lea.vmem %s2123_s18, 2048 }
  0x8c   : > { %v2062_v53 = vrot.slane %v853_v51, %v857_v50  ;;  %v2065_v54 = vrot.slane %v853_v51, %v861_v52  ;;  %p1563_p12 = scmp.ne.s32.totalorder %s2123_s18, %s1562_s15  ;;  %s1566_s29 = sshll.u32 %s1719_s24, 4  ;;  %s1567_s29 = int_to_ptr.vmem [resolvable:$false] %s1566_s29 }
  0x8d   : > { %s1023_s28 = sadd.s32 %s1292_s26, %s2055_s4  ;;  %p2257_p9 = scmp.ne.s32.totalorder %s2255_s0, 0 }
  0x8e   : > { %654 = vmatpush1.bf16.msra.mxu0 %v1450_v14  ;;  %1282 = vmatpush1.bf16.msra.mxu1 %v1450_v14  ;;  %s1238_s10 = sshll.u32 %s1023_s28, 6  ;;  %s1568_s7 = scalar_lea.vmem %s1567_s29, 4096 }
  0x8f   : > { %655 = vmatprep.subr.bf16.mxu0 %v1451_v16  ;;  %1267 = vmatprep.subr.bf16.mxu1 %v1451_v16  ;;  %s2121_s4 = scalar_lea.hbm %s2256_s8, %s1238_s10  ;;  %p1564_p0 = pnand %p1563_p12, %p2257_p9 }
  0x90   : > { %p1569_p10 = scmp.lt.s32.totalorder %s2123_s18, %s1567_s29  ;;  %p1570_p8 = scmp.lt.s32.totalorder %s1568_s7, %s1562_s15 }
  0x91   : > { %p1565_p4 = pneg %p1564_p0 }
  0x92   : > { %656 = vmatpush1.bf16.msra.mxu0 %v1453_v17  ;;  %1283 = vmatpush1.bf16.msra.mxu1 %v1453_v17  ;;  %p1571_p11 = por %p1570_p8, %p1569_p10 }
  0x93   : > { %657 = vmatprep.subr.bf16.mxu0 %v1454_v18  ;;  %1268 = vmatprep.subr.bf16.mxu1 %v1454_v18 }
  0x94   : > { %p1572_p2 = pnand %p1571_p11, %p1565_p4 }
  0x96   : > { %658 = vmatpush1.bf16.msra.mxu0 %v1456_v19  ;;  %1284 = vmatpush1.bf16.msra.mxu1 %v1456_v19 }
  0x97   : > { %659 = vmatprep.subr.bf16.mxu0 %v1457_v20  ;;  %1269 = vmatprep.subr.bf16.mxu1 %v1457_v20 }
  0x9a   : > { %660 = vmatpush1.bf16.msra.mxu0 %v1459_v21  ;;  %1285 = vmatpush1.bf16.msra.mxu1 %v1459_v21 }
  0x9b   : > { %661 = vmatprep.subr.bf16.mxu0 %v1460_v22  ;;  %1270 = vmatprep.subr.bf16.mxu1 %v1460_v22 }
  0x9e   : > { %662 = vmatpush1.bf16.msra.mxu0 %v1462_v23  ;;  %1286 = vmatpush1.bf16.msra.mxu1 %v1462_v23 }
  0x9f   : > { %663 = vmatprep.subr.bf16.mxu0 %v1463_v24  ;;  %1271 = vmatprep.subr.bf16.mxu1 %v1463_v24 }
  0xa2   : > { %664 = vmatpush1.bf16.msra.mxu0 %v1465_v25  ;;  %1287 = vmatpush1.bf16.msra.mxu1 %v1465_v25 }
  0xa3   : > { %665 = vmatprep.subr.bf16.mxu0 %v1466_v26  ;;  %1272 = vmatprep.subr.bf16.mxu1 %v1466_v26 }
  0xa6   : > { %666 = vmatpush1.bf16.msra.mxu0 %v1468_v27  ;;  %1288 = vmatpush1.bf16.msra.mxu1 %v1468_v27 }
  0xa7   : > { %667 = vmatprep.subr.bf16.mxu0 %v1469_v28  ;;  %1273 = vmatprep.subr.bf16.mxu1 %v1469_v28 }
  0xaa   : > { %668 = vmatpush1.bf16.msra.mxu0 %v1471_v29  ;;  %1289 = vmatpush1.bf16.msra.mxu1 %v1471_v29 }
  0xab   : > { %669 = vmatprep.subr.bf16.mxu0 %v1472_v30  ;;  %1274 = vmatprep.subr.bf16.mxu1 %v1472_v30 }
  0xae   : > { %670 = vmatpush1.bf16.msra.mxu0 %v1474_v31  ;;  %1290 = vmatpush1.bf16.msra.mxu1 %v1474_v31 }
  0xaf   : > { %671 = vmatprep.subr.bf16.mxu0 %v1475_v32  ;;  %1275 = vmatprep.subr.bf16.mxu1 %v1475_v32 }
  0xb2   : > { %672 = vmatpush1.bf16.msra.mxu0 %v1477_v33  ;;  %1291 = vmatpush1.bf16.msra.mxu1 %v1477_v33 }
  0xb5   : > { %674 = vmatmul.mubr.bf16.vlgmr.msra.gmra.mrb[0].mxu0 %v1478_v34  ;;  %714 = vmatmul.mubr.bf16.vlgmr.msra.gmra.mrb[0].mxu1 %v1481_v35 }
  0xb6   : > { %683 = vmatprep.mubr.bf16.mxu0 %v1484_v36  ;;  %723 = vmatprep.mubr.bf16.mxu1 %v1486_v37 }
  0xbd   : > { %684 = vmatmul.mubr.bf16.gmra.mrb[4].mxu0 %v1488_v38  ;;  %724 = vmatmul.mubr.bf16.gmra.mrb[4].mxu1 %v1489_v39 }
  0xbe   : > { %693 = vmatprep.mubr.bf16.mxu0 %v1490_v40  ;;  %733 = vmatprep.mubr.bf16.mxu1 %v1492_v41 }
  0xc5   : > { %694 = vmatmul.mubr.bf16.gmra.mrb[8].mxu0 %v1494_v42  ;;  %734 = vmatmul.mubr.bf16.gmra.mrb[8].mxu1 %v1495_v43 }
  0xc6   : > { %703 = vmatprep.mubr.bf16.mxu0 %v1496_v44  ;;  %743 = vmatprep.mubr.bf16.mxu1 %v1498_v45 }
  0xcd   : > { %704 = vmatmul.mubr.bf16.gmra.mrb[12].mxu0 %v1500_v46  ;;  %744 = vmatmul.mubr.bf16.gmra.mrb[12].mxu1 %v1501_v47 }
 0x188   : > { %v675_v55 = vpop.f32.mrb[0].mxu0  ;;  %v715_v56 = vpop.f32.mrb[0].mxu1 }
 0x189   : > { %v865_v57 = vadd.f32 %v2062_v53, %v675_v55  ;;  %v881_v58 = vadd.f32 %v2062_v53, %v715_v56  ;;  %v677_v59 = vpop.f32.mrb[1].mxu0  ;;  %v717_v60 = vpop.f32.mrb[1].mxu1 }
 0x18a   : > { %v866_v61 = vadd.f32 %v2065_v54, %v677_v59  ;;  %v882_v62 = vadd.f32 %v2065_v54, %v717_v60  ;;  %v679_v63 = vpop.f32.mrb[2].mxu0  ;;  %v719_v0 = vpop.f32.mrb[2].mxu1 }
 0x18b   : > { %v867_v1 = vadd.f32 %v2062_v53, %v679_v63  ;;  %v883_v2 = vadd.f32 %v2062_v53, %v719_v0  ;;  %v681_v3 = vpop.f32.mrb[3].mxu0  ;;  %v721_v4 = vpop.f32.mrb[3].mxu1 }
 0x18c   : > { %v1244_v5 = vpack.c.bf16 %v866_v61, %v865_v57  ;;  %v1252_v6 = vpack.c.bf16 %v882_v62, %v881_v58  ;;  %v868_v7 = vadd.f32 %v2065_v54, %v681_v3  ;;  %v884_v8 = vadd.f32 %v2065_v54, %v721_v4 }
 0x18e   : > { %993 = vst [vmem:[%s2077_s2] sm:$0xff] %v1244_v5  ;;  %1001 = vst [vmem:[%s2077_s2 + $0x40] sm:$0xff] %v1252_v6  ;;  %v1245_v9 = vpack.c.bf16 %v868_v7, %v867_v1  ;;  %v1253_v10 = vpack.c.bf16 %v884_v8, %v883_v2 }
 0x190   : > { %994 = vst [vmem:[%s2077_s2 + $0x8] sm:$0xff] %v1245_v9  ;;  %1002 = vst [vmem:[%s2077_s2 + $0x48] sm:$0xff] %v1253_v10  ;;  %v685_v11 = vpop.f32.mrb[4].mxu0  ;;  %v725_v12 = vpop.f32.mrb[4].mxu1 }
 0x191   : > { %v869_v13 = vadd.f32 %v2062_v53, %v685_v11  ;;  %v885_v14 = vadd.f32 %v2062_v53, %v725_v12  ;;  %v687_v15 = vpop.f32.mrb[5].mxu0  ;;  %v727_v16 = vpop.f32.mrb[5].mxu1 }
 0x192   : > { %v870_v17 = vadd.f32 %v2065_v54, %v687_v15  ;;  %v886_v18 = vadd.f32 %v2065_v54, %v727_v16  ;;  %v689_v19 = vpop.f32.mrb[6].mxu0  ;;  %v729_v20 = vpop.f32.mrb[6].mxu1 }
 0x193   : > { %v871_v21 = vadd.f32 %v2062_v53, %v689_v19  ;;  %v887_v22 = vadd.f32 %v2062_v53, %v729_v20  ;;  %v691_v23 = vpop.f32.mrb[7].mxu0  ;;  %v731_v24 = vpop.f32.mrb[7].mxu1 }
 0x194   : > { %v1246_v25 = vpack.c.bf16 %v870_v17, %v869_v13  ;;  %v1254_v26 = vpack.c.bf16 %v886_v18, %v885_v14  ;;  %v872_v27 = vadd.f32 %v2065_v54, %v691_v23  ;;  %v888_v28 = vadd.f32 %v2065_v54, %v731_v24 }
 0x196   : > { %995 = vst [vmem:[%s2077_s2 + $0x10] sm:$0xff] %v1246_v25  ;;  %1003 = vst [vmem:[%s2077_s2 + $0x50] sm:$0xff] %v1254_v26  ;;  %v1247_v29 = vpack.c.bf16 %v872_v27, %v871_v21  ;;  %v1255_v30 = vpack.c.bf16 %v888_v28, %v887_v22 }
 0x198   : > { %996 = vst [vmem:[%s2077_s2 + $0x18] sm:$0xff] %v1247_v29  ;;  %1004 = vst [vmem:[%s2077_s2 + $0x58] sm:$0xff] %v1255_v30  ;;  %v695_v31 = vpop.f32.mrb[8].mxu0  ;;  %v735_v32 = vpop.f32.mrb[8].mxu1 }
 0x199   : > { %v873_v33 = vadd.f32 %v2062_v53, %v695_v31  ;;  %v889_v34 = vadd.f32 %v2062_v53, %v735_v32  ;;  %v697_v35 = vpop.f32.mrb[9].mxu0  ;;  %v737_v36 = vpop.f32.mrb[9].mxu1 }
 0x19a   : > { %v874_v37 = vadd.f32 %v2065_v54, %v697_v35  ;;  %v890_v38 = vadd.f32 %v2065_v54, %v737_v36  ;;  %v699_v39 = vpop.f32.mrb[10].mxu0  ;;  %v739_v40 = vpop.f32.mrb[10].mxu1 }
 0x19b   : > { %v875_v41 = vadd.f32 %v2062_v53, %v699_v39  ;;  %v891_v42 = vadd.f32 %v2062_v53, %v739_v40  ;;  %v701_v43 = vpop.f32.mrb[11].mxu0  ;;  %v741_v44 = vpop.f32.mrb[11].mxu1 }
 0x19c   : > { %v1248_v45 = vpack.c.bf16 %v874_v37, %v873_v33  ;;  %v1256_v46 = vpack.c.bf16 %v890_v38, %v889_v34  ;;  %v876_v47 = vadd.f32 %v2065_v54, %v701_v43  ;;  %v892_v48 = vadd.f32 %v2065_v54, %v741_v44 }
 0x19e   : > { %997 = vst [vmem:[%s2077_s2 + $0x20] sm:$0xff] %v1248_v45  ;;  %1005 = vst [vmem:[%s2077_s2 + $0x60] sm:$0xff] %v1256_v46  ;;  %v1249_v49 = vpack.c.bf16 %v876_v47, %v875_v41  ;;  %v1257_v50 = vpack.c.bf16 %v892_v48, %v891_v42 }
 0x1a0   : > { %998 = vst [vmem:[%s2077_s2 + $0x28] sm:$0xff] %v1249_v49  ;;  %1006 = vst [vmem:[%s2077_s2 + $0x68] sm:$0xff] %v1257_v50  ;;  %v705_v51 = vpop.f32.mrb[12].mxu0  ;;  %v745_v52 = vpop.f32.mrb[12].mxu1 }
 0x1a1   : > { %v877_v55 = vadd.f32 %v2062_v53, %v705_v51  ;;  %v893_v56 = vadd.f32 %v2062_v53, %v745_v52  ;;  %v707_v57 = vpop.f32.mrb[13].mxu0  ;;  %v747_v58 = vpop.f32.mrb[13].mxu1 }
 0x1a2   : > { %v878_v59 = vadd.f32 %v2065_v54, %v707_v57  ;;  %v894_v60 = vadd.f32 %v2065_v54, %v747_v58  ;;  %v709_v61 = vpop.f32.mrb[14].mxu0  ;;  %v749_v62 = vpop.f32.mrb[14].mxu1 }
 0x1a3   : > { %v879_v63 = vadd.f32 %v2062_v53, %v709_v61  ;;  %v895_v0 = vadd.f32 %v2062_v53, %v749_v62  ;;  %v711_v1 = vpop.f32.mrb[15].mxu0  ;;  %v751_v2 = vpop.f32.mrb[15].mxu1 }
 0x1a4   : > { %v1250_v3 = vpack.c.bf16 %v878_v59, %v877_v55  ;;  %v1258_v4 = vpack.c.bf16 %v894_v60, %v893_v56  ;;  %v880_v5 = vadd.f32 %v2065_v54, %v711_v1  ;;  %v896_v6 = vadd.f32 %v2065_v54, %v751_v2 }
 0x1a6   : > { %999 = vst [vmem:[%s2077_s2 + $0x30] sm:$0xff] %v1250_v3  ;;  %1007 = vst [vmem:[%s2077_s2 + $0x70] sm:$0xff] %v1258_v4  ;;  %v1251_v53 = vpack.c.bf16 %v880_v5, %v879_v63  ;;  %v1259_v7 = vpack.c.bf16 %v896_v6, %v895_v0 }
 0x1a8   : > { %1000 = vst [vmem:[%s2077_s2 + $0x38] sm:$0xff] %v1251_v53  ;;  %1008 = vst [vmem:[%s2077_s2 + $0x78] sm:$0xff] %v1259_v7 }
 0x1a9   : > { %1575 = shalt.err (!%p1572_p2)
}
 0x1aa   : > { %s1576_s5 = scalar_lea.hbm %s2121_s4, 2048  ;;  %s1580_s22 = scalar_lea.hbm %s2256_s8, 30720 }
 0x1ab   : > { %p1577_p5 = scmp.ne.s32.totalorder %s2121_s4, %s1576_s5  ;;  %p1581_p13 = scmp.lt.u32.totalorder %s2121_s4, %s2256_s8 }
 0x1ac   : > { %p1582_p6 = scmp.lt.u32.totalorder %s1580_s22, %s1576_s5  ;;  %p1584_p12 = scmp.lt.u32.totalorder %s1576_s5, %s2121_s4 }
 0x1ad   : > { %p1578_p3 = pnand %p1577_p5, %p2257_p9 }
 0x1ae   : > { %p1583_p1 = por %p1582_p6, %p1581_p13 }
 0x1af   : > { %p1579_p7 = pneg %p1578_p3 }
 0x1b0   : > { %p1585_p0 = por %p1584_p12, %p1583_p1 }
 0x1b2   : > { %p1586_p4 = pnand %p1585_p0, %p1579_p7 }
 0x1b4   : > { %1589 = shalt.err (!%p1586_p4)
}
 0x1b5   : > { %s1720_s10 = smov 128   ;;  %s1721_s27 = smov 384  }
 0x1b6   : > { %s1722_s9 = smov 8  }
 0x1b7   : > { %1297 = dma.vmem_to_hbm [thread:$0]  (%p2257_p9), %s2123_s18, 2048, %s2121_s4, %s2131_s11, %s1720_s10, %s1721_s27, %s1722_s9  }
 0x1b8 PF: > { %p1311_p10 = scmp.ge.s32.totalorder %s1712_s25, 2  ;;  %s1041_s15 = sand.u32 1, %s1660_s12  }
 0x1b9   : > { %p2258_p8 = scmp.ne.s32.totalorder %s2246_s30, 0  ;;  %s1042_s24 = scalar_lea.sflag [#allocation5], %s1041_s15 }
 0x1bb   : > { %p1307_p11 = pnand %p1311_p10, %p2258_p8 }
 0x1bd   : > { %1655 = dma.done.wait (!%p1307_p11), %s1042_s24, 2048  }
 0x1be   : > { %1657 = vsyncadd (!%p1307_p11), %s1042_s24, 4294965248  ;;  %s22_s25 = sadd.s32 1, %s1712_s25   ;;  %s2260_s18 = sld [smem:[#allocation16_spill]] }
 0x1bf   : > { %p2160_p2 = scmp.ge.s32.totalorder %s22_s25, 17   ;;  %s2261_s22 = sld [smem:[#allocation13_spill]] }
 0x1c0   : > { %s2262_s30 = sld [smem:[#allocation14_spill]]  ;;  %s2263_s24 = sld [smem:[#allocation15_spill]] }
 0x1c1   : > { %s2264_s12 = smov %s1664_s13  ;;  %s2265_s13 = smov %s1668_s14 }
 0x1c2   : > { %s2266_s14 = smov %s1937_s3  ;;  %s2267_s15 = smov %s1676_s16 }
 0x1c3   : > { %s2268_s16 = smov %s1680_s17  ;;  %s2273_s21 = smov %s1704_s23 }
 0x1c4   : > { %s2269_s17 = smov %s2260_s18  ;;  %s2270_s18 = smov %s1688_s19 }
 0x1c5   : > { %s2271_s19 = smov %s1692_s20  ;;  %s2272_s20 = smov %s1934_s6 }
 0x1c6   : > { %s2274_s23 = smov %s2262_s30  ;;  %21 = sbr.rel (!%p2160_p2) target bundleno = 16 (0x10), region = 101 }
 0x1cd   :  { %1047 = vsyncpa [#allocation4], 1 }
 0x1ce   :  { %1049 = vsyncpa [#allocation4 + $0x1], 1 }
 0x1cf   :  { %1050 = vsyncpa [#allocation7], 1 }
 0x1d0   :  { %1052 = vsyncpa [#allocation7 + $0x1], 1 }
 0x1d1   :  { %1053 = vsyncpa [#allocation5], 1 }
 0x1d2   :  { %1055 = vsyncpa [#allocation5 + $0x1], 1 }

</bundles_post_ra>
